<compile_context>
chip_gen: v7x
topology: tpu7x:2x2x1
jax: 0.10.0
libtpu: 0.0.40
codegen_flags: <defaults>
</compile_context>

<pallas_src>
import functools

import jax
import jax.numpy as jnp
from jax.experimental import pallas as pl
from jax.experimental.pallas import tpu as pltpu

LANE = 128
SUBLANE_BF16 = 16


def _round_up(x, m):
    return (x + m - 1) // m * m


# ----------------------------------------------------------------------------
# Fused decoder kernel: all linear layers + activations for one batch tile
# ----------------------------------------------------------------------------
def _decoder_kernel(*refs, n_layers, conditional, latent_size):
    idx = 0
    z_ref = refs[idx]; idx += 1
    if conditional:
        c_ref = refs[idx]; idx += 1
    o_ref = refs[-1]
    p_refs = refs[idx:-1]

    # f32 input tile [Bt, in_width]; for the conditional case the label lanes
    # arrive zero-padded and the one-hot is added here, so layer 0 is a single
    # matmul against the unsplit W0.
    x = z_ref[...]
    if conditional:
        c = c_ref[...]                                          # int32 [Bt, 1]
        col = jax.lax.broadcasted_iota(jnp.int32, x.shape, 1)
        onehot = jnp.logical_and(col - latent_size == c,
                                 col >= latent_size).astype(jnp.float32)
        # Out-of-range labels contribute nothing (matches previous behavior).
        x = x + onehot

    p = 0
    for i in range(n_layers):
        w, b = p_refs[p], p_refs[p + 1]
        p += 2
        # bf16 MXU operands, f32 accumulation; elementwise stays f32 (v5e-safe).
        y = jnp.dot(x.astype(w.dtype), w[...],
                    preferred_element_type=jnp.float32) + b[...]
        if i + 1 < n_layers:
            x = jnp.maximum(y, 0.0)
        else:
            x = jax.nn.sigmoid(y)

    o_ref[...] = x                                              # f32 [Bt, out_size]


# ----------------------------------------------------------------------------
# Decoder module (mirrors the PyTorch nn.Module semantics)
# ----------------------------------------------------------------------------
class DecoderPallas:
    def __init__(self, layer_sizes, latent_size, conditional, num_labels, key):
        self.layer_sizes = list(layer_sizes)
        self.latent_size = int(latent_size)
        self.conditional = bool(conditional)
        self.num_labels = int(num_labels)
        self.input_size = (self.latent_size + self.num_labels
                           if self.conditional else self.latent_size)

        in_sizes = [self.input_size] + self.layer_sizes[:-1]

        # f32 reference parameters; init matches nn.Linear U(-1/sqrt(in), 1/sqrt(in)).
        self.ref_params = []
        for in_size, out_size in zip(in_sizes, self.layer_sizes):
            key, wk, bk = jax.random.split(key, 3)
            bound = 1.0 / float(in_size) ** 0.5
            w = jax.random.uniform(wk, (in_size, out_size), jnp.float32, -bound, bound)
            b = jax.random.uniform(bk, (out_size,), jnp.float32, -bound, bound)
            self.ref_params.append((w, b))

        # Padded bf16 kernel parameters (built ONCE at init).
        #  * Hidden-layer output dims padded to a multiple of 128 (lane-dense
        #    intermediates; zero cols + zero bias -> zero pre-act -> ReLU 0).
        #  * Last layer keeps its true output width (no inflated writeback).
        #  * Row dims padded to the previous layer's padded width.
        self.kernel_params = []
        n = len(self.layer_sizes)
        prev_pad = self.input_size
        for i, (w, b) in enumerate(self.ref_params):
            in_size, out_size = w.shape
            out_pad = out_size if i == n - 1 else _round_up(out_size, LANE)
            w_p = jnp.pad(w, ((0, prev_pad - in_size), (0, out_pad - out_size)))
            b_p = jnp.pad(b.reshape(1, -1), ((0, 0), (0, out_pad - out_size)))
            self.kernel_params.append(w_p.astype(jnp.bfloat16))
            self.kernel_params.append(b_p)                       # f32
            prev_pad = out_pad

    def __call__(self, z, c=None):
        B = z.shape[0]
        out_size = self.layer_sizes[-1]
        in_width = self.input_size

        # Batch tile: multiple of 16 (bf16 sublane pack); capped at 256 so each
        # grid step streams a long LHS through the MXU per (resident) weight.
        Bt = _round_up(min(B, 256), SUBLANE_BF16)
        B_pad = _round_up(B, Bt)
        n_tiles = B_pad // Bt

        # Single wrapper-side pad: batch rows up to B_pad and (conditional) the
        # label lanes up to in_width.  z stays f32; bf16 cast is in-kernel.
        z = jnp.asarray(z, jnp.float32)
        z_in = jnp.pad(z, ((0, B_pad - B), (0, in_width - self.latent_size)))

        batch_map = lambda i: (i, 0)
        const_map = lambda i: (0, 0)

        inputs = [z_in]
        in_specs = [pl.BlockSpec((Bt, in_width), batch_map)]
        if self.conditional:
            c_in = jnp.asarray(c).reshape(-1).astype(jnp.int32)
            c_in = jnp.pad(c_in, (0, B_pad - B)).reshape(B_pad, 1)
            inputs.append(c_in)
            in_specs.append(pl.BlockSpec((Bt, 1), batch_map))
        for p in self.kernel_params:
            inputs.append(p)
            # Full-block weights/biases with a constant index_map: loaded once,
            # revisited (never re-DMA'd) across the batch grid.
            in_specs.append(pl.BlockSpec(p.shape, const_map))

        kernel = functools.partial(
            _decoder_kernel,
            n_layers=len(self.layer_sizes),
            conditional=self.conditional,
            latent_size=self.latent_size,
        )

        # VMEM budget per call (must stay well under v7x's 64 MiB per TC).
        param_bytes = sum(int(p.size) * p.dtype.itemsize for p in self.kernel_params)
        max_w = max([in_width] + [w.shape[1] for w in self.kernel_params[0::2]])
        io_tile = Bt * in_width * 4 + (Bt * 4 if self.conditional else 0) + Bt * out_size * 4
        act_bytes = 8 * Bt * max_w * 4
        vmem_limit = int(min(48 << 20,
                             max(16 << 20,
                                 param_bytes + 2 * io_tile + act_bytes + (4 << 20))))

        flops = 2 * B_pad * sum(w.shape[0] * w.shape[1]
                                for w in self.kernel_params[0::2])
        bytes_accessed = (sum(int(a.size) * a.dtype.itemsize for a in inputs)
                          + B_pad * out_size * 4)

        out = pl.pallas_call(
            kernel,
            grid=(n_tiles,),
            out_shape=jax.ShapeDtypeStruct((B_pad, out_size), jnp.float32),
            in_specs=in_specs,
            out_specs=pl.BlockSpec((Bt, out_size), batch_map),
            compiler_params=pltpu.CompilerParams(
                dimension_semantics=("parallel",),
                vmem_limit_bytes=vmem_limit),
            cost_estimate=pl.CostEstimate(
                flops=flops,
                transcendentals=B_pad * out_size,
                bytes_accessed=bytes_accessed),
        )(*inputs)
        return out[:B] if B_pad != B else out


# ----------------------------------------------------------------------------
# Pure-JAX reference (mirrors the kernel's bf16-operand / f32-accum numerics)
# ----------------------------------------------------------------------------
def decoder_ref(dec: DecoderPallas, z, c=None):
    z = jnp.asarray(z, jnp.float32)
    if dec.conditional:
        onehot = jax.nn.one_hot(jnp.asarray(c).reshape(-1), dec.num_labels,
                                dtype=jnp.float32)
        x = jnp.concatenate([z, onehot], axis=-1)
    else:
        x = z
    n = len(dec.ref_params)
    for i, (w, b) in enumerate(dec.ref_params):
        xb = x.astype(jnp.bfloat16).astype(jnp.float32)
        wb = w.astype(jnp.bfloat16).astype(jnp.float32)
        y = xb @ wb + b
        x = jnp.maximum(y, 0.0) if i + 1 < n else jax.nn.sigmoid(y)
    return x


if __name__ == "__main__":
    key = jax.random.PRNGKey(0)
    k_params, k_params2, k_z, k_c = jax.random.split(key, 4)

    # Small shapes consistent with the module: latent_size=8, num_labels=10,
    # hidden layers [32, 64], output 16, batch 8.
    layer_sizes = [32, 64, 16]
    latent_size = 8
    num_labels = 10
    batch = 8

    # Conditional decoder.
    dec = DecoderPallas(layer_sizes, latent_size, conditional=True,
                        num_labels=num_labels, key=k_params)
    z = jax.random.normal(k_z, (batch, latent_size), jnp.float32)
    c = jax.random.randint(k_c, (batch,), 0, num_labels, jnp.int32)
    out = jax.block_until_ready(dec(z, c))
    ref = decoder_ref(dec, z, c)
    assert out.shape == (batch, layer_sizes[-1])
    max_err = float(jnp.max(jnp.abs(out - ref)))
    assert jnp.allclose(out, ref, atol=1e-4, rtol=1e-4), (
        f"conditional mismatch vs reference, max abs err {max_err}")

    # Unconditional decoder (exercises the other branch).
    dec_u = DecoderPallas(layer_sizes, latent_size, conditional=False,
                          num_labels=num_labels, key=k_params2)
    out_u = jax.block_until_ready(dec_u(z))
    ref_u = decoder_ref(dec_u, z)
    assert out_u.shape == (batch, layer_sizes[-1])
    max_err_u = float(jnp.max(jnp.abs(out_u - ref_u)))
    assert jnp.allclose(out_u, ref_u, atol=1e-4, rtol=1e-4), (
        f"unconditional mismatch vs reference, max abs err {max_err_u}")

    print("KERNEL_OK")
</pallas_src>

<mosaic_0001>
module attributes {stable_mosaic.version = 11 : i64} {
  func.func @_decoder_kernel(%arg0: i32, %arg1: memref<16x18xf32, #tpu.memory_space<vmem>>, %arg2: memref<16x1xi32, #tpu.memory_space<vmem>>, %arg3: memref<18x128xbf16, #tpu.memory_space<vmem>>, %arg4: memref<1x128xf32, #tpu.memory_space<vmem>>, %arg5: memref<128x128xbf16, #tpu.memory_space<vmem>>, %arg6: memref<1x128xf32, #tpu.memory_space<vmem>>, %arg7: memref<128x16xbf16, #tpu.memory_space<vmem>>, %arg8: memref<1x16xf32, #tpu.memory_space<vmem>>, %arg9: memref<16x16xf32, #tpu.memory_space<vmem>>) attributes {dimension_semantics = [#tpu.dimension_semantics<parallel>], iteration_bounds = array<i64: 1>, scalar_prefetch = 0 : i64, scratch_operands = 0 : i64, tpu.core_type = #tpu.core_type<tc>, window_params = [{transform_indices = @transform_0, window_bounds = array<i64: 16, 18>}, {transform_indices = @transform_1, window_bounds = array<i64: 16, 1>}, {pipeline_mode = #tpu.pipeline_mode<synchronous>, transform_indices = @transform_2, window_bounds = array<i64: 18, 128>}, {pipeline_mode = #tpu.pipeline_mode<synchronous>, transform_indices = @transform_3, window_bounds = array<i64: 1, 128>}, {pipeline_mode = #tpu.pipeline_mode<synchronous>, transform_indices = @transform_4, window_bounds = array<i64: 128, 128>}, {pipeline_mode = #tpu.pipeline_mode<synchronous>, transform_indices = @transform_5, window_bounds = array<i64: 1, 128>}, {pipeline_mode = #tpu.pipeline_mode<synchronous>, transform_indices = @transform_6, window_bounds = array<i64: 128, 16>}, {pipeline_mode = #tpu.pipeline_mode<synchronous>, transform_indices = @transform_7, window_bounds = array<i64: 1, 16>}, {transform_indices = @transform_8, window_bounds = array<i64: 16, 16>}]} {
    %c0 = arith.constant 0 : index
    %c0_0 = arith.constant 0 : index
    %0 = vector.load %arg1[%c0, %c0_0] : memref<16x18xf32, #tpu.memory_space<vmem>>, vector<16x18xf32>
    %c0_1 = arith.constant 0 : index
    %c0_2 = arith.constant 0 : index
    %1 = vector.load %arg2[%c0_1, %c0_2] : memref<16x1xi32, #tpu.memory_space<vmem>>, vector<16x1xi32>
    %2 = tpu.iota {dimensions = array<i32: 1>} : vector<16x18xi32>
    %c8_i32 = arith.constant 8 : i32
    %3 = vector.broadcast %c8_i32 : i32 to vector<16x18xi32>
    %4 = arith.subi %2, %3 : vector<16x18xi32>
    %5 = vector.broadcast %1 : vector<16x1xi32> to vector<16x18xi32>
    %6 = arith.cmpi eq, %4, %5 : vector<16x18xi32>
    %c8_i32_3 = arith.constant 8 : i32
    %7 = vector.broadcast %c8_i32_3 : i32 to vector<16x18xi32>
    %8 = arith.cmpi sge, %2, %7 : vector<16x18xi32>
    %9 = arith.andi %6, %8 : vector<16x18xi1>
    %10 = arith.extui %9 : vector<16x18xi1> to vector<16x18xi32>
    %11 = arith.sitofp %10 : vector<16x18xi32> to vector<16x18xf32>
    %12 = arith.addf %0, %11 : vector<16x18xf32>
    %13 = arith.truncf %12 : vector<16x18xf32> to vector<16x18xbf16>
    %c0_4 = arith.constant 0 : index
    %c0_5 = arith.constant 0 : index
    %14 = vector.load %arg3[%c0_4, %c0_5] : memref<18x128xbf16, #tpu.memory_space<vmem>>, vector<18x128xbf16>
    %cst = arith.constant dense<0.000000e+00> : vector<16x128xf32>
    %15 = tpu.matmul %13, %14, %cst {dimension_numbers = #tpu.dot_dimension_numbers<[1], [0], [0], [1], [0, 0, 1, 1], [], []>} : vector<16x18xbf16>, vector<18x128xbf16>, vector<16x128xf32> -> vector<16x128xf32>
    %c0_6 = arith.constant 0 : index
    %c0_7 = arith.constant 0 : index
    %16 = vector.load %arg4[%c0_6, %c0_7] : memref<1x128xf32, #tpu.memory_space<vmem>>, vector<1x128xf32>
    %17 = vector.broadcast %16 : vector<1x128xf32> to vector<16x128xf32>
    %18 = arith.addf %15, %17 : vector<16x128xf32>
    %cst_8 = arith.constant 0.000000e+00 : f32
    %19 = vector.broadcast %cst_8 : f32 to vector<16x128xf32>
    %20 = arith.maximumf %18, %19 : vector<16x128xf32>
    %21 = arith.truncf %20 : vector<16x128xf32> to vector<16x128xbf16>
    %c0_9 = arith.constant 0 : index
    %c0_10 = arith.constant 0 : index
    %22 = vector.load %arg5[%c0_9, %c0_10] : memref<128x128xbf16, #tpu.memory_space<vmem>>, vector<128x128xbf16>
    %cst_11 = arith.constant dense<0.000000e+00> : vector<16x128xf32>
    %23 = tpu.matmul %21, %22, %cst_11 {dimension_numbers = #tpu.dot_dimension_numbers<[1], [0], [0], [1], [0, 0, 1, 1], [], []>} : vector<16x128xbf16>, vector<128x128xbf16>, vector<16x128xf32> -> vector<16x128xf32>
    %c0_12 = arith.constant 0 : index
    %c0_13 = arith.constant 0 : index
    %24 = vector.load %arg6[%c0_12, %c0_13] : memref<1x128xf32, #tpu.memory_space<vmem>>, vector<1x128xf32>
    %25 = vector.broadcast %24 : vector<1x128xf32> to vector<16x128xf32>
    %26 = arith.addf %23, %25 : vector<16x128xf32>
    %cst_14 = arith.constant 0.000000e+00 : f32
    %27 = vector.broadcast %cst_14 : f32 to vector<16x128xf32>
    %28 = arith.maximumf %26, %27 : vector<16x128xf32>
    %29 = arith.truncf %28 : vector<16x128xf32> to vector<16x128xbf16>
    %c0_15 = arith.constant 0 : index
    %c0_16 = arith.constant 0 : index
    %30 = vector.load %arg7[%c0_15, %c0_16] : memref<128x16xbf16, #tpu.memory_space<vmem>>, vector<128x16xbf16>
    %cst_17 = arith.constant dense<0.000000e+00> : vector<16x16xf32>
    %31 = tpu.matmul %29, %30, %cst_17 {dimension_numbers = #tpu.dot_dimension_numbers<[1], [0], [0], [1], [0, 0, 1, 1], [], []>} : vector<16x128xbf16>, vector<128x16xbf16>, vector<16x16xf32> -> vector<16x16xf32>
    %c0_18 = arith.constant 0 : index
    %c0_19 = arith.constant 0 : index
    %32 = vector.load %arg8[%c0_18, %c0_19] : memref<1x16xf32, #tpu.memory_space<vmem>>, vector<1x16xf32>
    %33 = vector.broadcast %32 : vector<1x16xf32> to vector<16x16xf32>
    %34 = arith.addf %31, %33 : vector<16x16xf32>
    %35 = arith.negf %34 : vector<16x16xf32>
    %36 = math.exp %35 : vector<16x16xf32>
    %cst_20 = arith.constant 1.000000e+00 : f32
    %37 = vector.broadcast %cst_20 : f32 to vector<16x16xf32>
    %38 = arith.addf %37, %36 : vector<16x16xf32>
    %39 = arith.divf %37, %38 : vector<16x16xf32>
    %c0_21 = arith.constant 0 : index
    %c0_22 = arith.constant 0 : index
    %40 = vector.load %arg9[%c0_21, %c0_22] : memref<16x16xf32, #tpu.memory_space<vmem>>, vector<16x16xf32>
    tpu.vector_store %arg9[%c0_21, %c0_22], %39 {strides = array<i32>} : memref<16x16xf32, #tpu.memory_space<vmem>>, vector<16x16xf32>,
    return
  }
  func.func @transform_0(%arg0: i32) -> (i32, i32) {
    %c0_i32 = arith.constant 0 : i32
    %c0_i32_0 = arith.constant 0 : i32
    return %arg0, %c0_i32 : i32, i32
  }
  func.func @transform_1(%arg0: i32) -> (i32, i32) {
    %c0_i32 = arith.constant 0 : i32
    %c0_i32_0 = arith.constant 0 : i32
    return %arg0, %c0_i32 : i32, i32
  }
  func.func @transform_2(%arg0: i32) -> (i32, i32) {
    %c0_i32 = arith.constant 0 : i32
    %c0_i32_0 = arith.constant 0 : i32
    %c0_i32_1 = arith.constant 0 : i32
    return %c0_i32, %c0_i32_0 : i32, i32
  }
  func.func @transform_3(%arg0: i32) -> (i32, i32) {
    %c0_i32 = arith.constant 0 : i32
    %c0_i32_0 = arith.constant 0 : i32
    %c0_i32_1 = arith.constant 0 : i32
    return %c0_i32, %c0_i32_0 : i32, i32
  }
  func.func @transform_4(%arg0: i32) -> (i32, i32) {
    %c0_i32 = arith.constant 0 : i32
    %c0_i32_0 = arith.constant 0 : i32
    %c0_i32_1 = arith.constant 0 : i32
    return %c0_i32, %c0_i32_0 : i32, i32
  }
  func.func @transform_5(%arg0: i32) -> (i32, i32) {
    %c0_i32 = arith.constant 0 : i32
    %c0_i32_0 = arith.constant 0 : i32
    %c0_i32_1 = arith.constant 0 : i32
    return %c0_i32, %c0_i32_0 : i32, i32
  }
  func.func @transform_6(%arg0: i32) -> (i32, i32) {
    %c0_i32 = arith.constant 0 : i32
    %c0_i32_0 = arith.constant 0 : i32
    %c0_i32_1 = arith.constant 0 : i32
    return %c0_i32, %c0_i32_0 : i32, i32
  }
  func.func @transform_7(%arg0: i32) -> (i32, i32) {
    %c0_i32 = arith.constant 0 : i32
    %c0_i32_0 = arith.constant 0 : i32
    %c0_i32_1 = arith.constant 0 : i32
    return %c0_i32, %c0_i32_0 : i32, i32
  }
  func.func @transform_8(%arg0: i32) -> (i32, i32) {
    %c0_i32 = arith.constant 0 : i32
    %c0_i32_0 = arith.constant 0 : i32
    return %arg0, %c0_i32 : i32, i32
  }
}

</mosaic_0001>

<bundles_post_ra>
// kernel: tpu_custom_call.1
= control target key start
LH: loop header
LB: loop body
LE: loop exit
PB: predicated region body
PF: predicated region fallthrough
CT: control target
= control target key end

     0   :  { %v538_v1 = vmov 0   ;;  %v539_v2 = vmov 0.0   ;;  %vm79_vm0 = vcmask 1040384   ;;  %vm540_vm1 = vmmov 0   ;;  %s702_s0 = inlined_call_operand.vmem [shape: f32[16,18], index: 0, kind: input, shape index: {}]   ;;  %s703_s1 = inlined_call_operand.vmem [shape: s32[16,1], index: 1, kind: input, shape index: {}]   ;;  %s704_s2 = inlined_call_operand.vmem [shape: bf16[18,128], index: 2, kind: input, shape index: {}]   ;;  %s705_s3 = inlined_call_operand.vmem [shape: f32[1,128], index: 3, kind: input, shape index: {}]   ;;  %s706_s4 = inlined_call_operand.vmem [shape: bf16[128,128], index: 4, kind: input, shape index: {}]   ;;  %s707_s5 = inlined_call_operand.vmem [shape: f32[1,128], index: 5, kind: input, shape index: {}]   ;;  %s708_s6 = inlined_call_operand.vmem [shape: bf16[128,16], index: 6, kind: input, shape index: {}]   ;;  %s709_s7 = inlined_call_operand.vmem [shape: f32[1,16], index: 7, kind: input, shape index: {}]   ;;  %s710_s8 = inlined_call_operand.hbm [shape: f32[16,16], index: 8, kind: output, shape index: {}]  }
   0x1   :  { %v33_v0 = vld [vmem:[%s703_s1] sm:$0xff]  ;;  %487 = vset.pattern.permute.xlu0 %v538_v1  ;;  %433 = vmatprep.subr.bf16.mxu0 %v539_v2  ;;  %v34_v3 = vld [vmem:[%s703_s1 + $0x8] sm:$0xff] }
   0x2   :  { %39 = vperm.xlu0 %487, %v33_v0   ;;  %441 = vmatprep.subr.bf16.mxu1 %v539_v2  ;;  %v488_v4 = vld [vmem:[%s704_s2] sm:$0xff]   ;;  %v489_v5 = vld [vmem:[%s704_s2 + $0x8] ss:$0 sps:$4 sm:$0x11]  }
   0x3   :  { %434 = vmatpush3.bf16.msra.mxu0 %v488_v4  ;;  %v81_v6 = vsel %vm79_vm0, %v489_v5, 0  ;;  %437 = vmatprep.mubr.msk.bf16.mxu0 %vm540_vm1, %v539_v2  ;;  %v490_v7 = vld [vmem:[%s706_s4] sm:$0xff]   ;;  %v491_v8 = vld [vmem:[%s706_s4 + $0x8] sm:$0xff]  }
   0x4   :  { %435 = vmatprep.subr.bf16.mxu0 %v539_v2  ;;  %457 = vmatprep.mubr.msk.bf16.mxu1 %vm540_vm1, %v539_v2 }
   0x5   :  { %442 = vmatpush3.bf16.msra.mxu1 %v490_v7 }
   0x6   :  { %42 = vperm.xlu0 %487, %v34_v3   ;;  %443 = vmatprep.subr.bf16.mxu1 %v539_v2 }
   0x7   :  { %436 = vmatpush3.bf16.msra.mxu0 %v81_v6 }
   0x8   :  { %461 = vmatprep.subr.bf16.mxu0 %v539_v2 }
   0x9   :  { %13 = vsyncpa [#allocation3], 0  ;;  %444 = vmatpush3.bf16.msra.mxu1 %v491_v8  ;;  %v492_v9 = vld [vmem:[%s706_s4 + $0x10] sm:$0xff]   ;;  %v493_v10 = vld [vmem:[%s706_s4 + $0x18] sm:$0xff]   ;;  %v35_v13 = vlaneseq  ;;  %vm75_vm7 = vcmask 146432   ;;  %vm366_vm8 = vcmask 130048  }
   0xa   :  { %445 = vmatprep.subr.bf16.mxu1 %v539_v2  ;;  %v494_v11 = vld [vmem:[%s706_s4 + $0x20] sm:$0xff]   ;;  %v495_v12 = vld [vmem:[%s706_s4 + $0x28] sm:$0xff]   ;;  %v496_v25 = vld [vmem:[%s706_s4 + $0x30] sm:$0xff]  }
   0xb   :  { %v36_v14 = vand.u32 127, %v35_v13  ;;  %v31_v18 = vld [vmem:[%s702_s0] sm:$0xff]  ;;  %v32_v20 = vld [vmem:[%s702_s0 + $0x8] sm:$0xff]  ;;  %v497_v26 = vld [vmem:[%s706_s4 + $0x38] sm:$0xff]  }
   0xc   :  { %v498_v27 = vld [vmem:[%s708_s6] sm:$0xff]   ;;  %v499_v28 = vld [vmem:[%s708_s6 + $0x8] sm:$0xff]   ;;  %v500_v29 = vld [vmem:[%s708_s6 + $0x10] sm:$0xff]  }
   0xd   :  { %446 = vmatpush3.bf16.msra.mxu1 %v492_v9  ;;  %v385_v15 = vadd.s32 4294967288, %v36_v14  ;;  %vm46_vm2 = vcmp.ge.s32.totalorder %v36_v14, 8  ;;  %v501_v30 = vld [vmem:[%s708_s6 + $0x18] sm:$0xff]   ;;  %v502_v31 = vld [vmem:[%s708_s6 + $0x20] sm:$0xff]   ;;  %v503_v32 = vld [vmem:[%s708_s6 + $0x28] sm:$0xff]  }
   0xe   :  { %447 = vmatprep.subr.bf16.mxu1 %v539_v2  ;;  %v388_v33 = vld [vmem:[%s705_s3] ss:$0 sm:$0xff]  ;;  %v504_v43 = vld [vmem:[%s708_s6 + $0x30] sm:$0xff]   ;;  %v505_v44 = vld [vmem:[%s708_s6 + $0x38] sm:$0xff]  }
   0xf   :  { %v392_v45 = vld [vmem:[%s707_s5] ss:$0 sm:$0xff]  ;;  %s541_s5 = smov [#allocation2]  }
  0x10   :  { %v401_v55 = vld [vmem:[%s709_s7] ss:$0 sm:$0xff]  ;;  %s374_s6 = sshll.u32 %s541_s5, 4  ;;  %s375_s6 = int_to_ptr.vmem [resolvable:$true] %s374_s6 }
  0x11   :  { %448 = vmatpush3.bf16.msra.mxu1 %v493_v10  ;;  %s514_s7 = scalar_lea.vmem %s375_s6, 256  ;;  %p519_p1 = scmp.lt.s32.totalorder %s375_s6, %s375_s6 }
  0x12   :  { %449 = vmatprep.subr.bf16.mxu1 %v539_v2  ;;  %p515_p0 = scmp.ne.s32.totalorder %s375_s6, %s514_s7  ;;  %p520_p2 = scmp.lt.s32.totalorder %s514_s7, %s514_s7 }
  0x14   :  { %p521_p3 = por %p520_p2, %p519_p1 }
  0x15   :  { %450 = vmatpush3.bf16.msra.mxu1 %v494_v11 }
  0x16   :  { %451 = vmatprep.subr.bf16.mxu1 %v539_v2  ;;  %p522_p4 = pnand %p521_p3, %p515_p0 }
  0x19   :  { %452 = vmatpush3.bf16.msra.mxu1 %v495_v12 }
  0x1a   :  { %453 = vmatprep.subr.bf16.mxu1 %v539_v2 }
  0x1d   :  { %454 = vmatpush3.bf16.msra.mxu1 %v496_v25 }
  0x1e   :  { %455 = vmatprep.subr.bf16.mxu1 %v539_v2 }
  0x21   :  { %456 = vmatpush3.bf16.msra.mxu1 %v497_v26 }
  0x81   :  { %v40_v16 = vpop.permute.xlu0 %39 }
  0x82   :  { %vm44_vm3 = vcmp.eq.s32.totalorder %v385_v15, %v40_v16 }
  0x83   :  { %vm47_vm4 = vmand %vm44_vm3, %vm46_vm2 }
  0x84   :  { %v386_v19 = vsel %vm47_vm4, 1.0, %v539_v2 }
  0x85   :  { %v43_v17 = vpop.permute.xlu0 %42  ;;  %v53_v22 = vadd.f32 %v386_v19, %v31_v18 }
  0x86   :  { %vm45_vm5 = vcmp.eq.s32.totalorder %v385_v15, %v43_v17 }
  0x87   :  { %vm48_vm6 = vmand %vm45_vm5, %vm46_vm2 }
  0x88   :  { %v387_v21 = vsel %vm48_vm6, 1.0, %v539_v2 }
  0x89   :  { %v54_v23 = vadd.f32 %v387_v21, %v32_v20 }
  0x8b   :  { %v55_v24 = vpack.c.bf16 %v54_v23, %v53_v22 }
  0x8d   :  { %438 = vmatmul.mubr.msk.bf16.vlgmr.msra.gmra.mrb[0].mxu0 %vm75_vm7, %v55_v24 }
  0x8e   :  { %477 = vmatprep.mubr.msk.bf16.mxu0 %vm540_vm1, %v539_v2  ;;  %462 = vmatpush3.bf16.msra.mxu0 %v498_v27 }
  0x8f   :  { %463 = vmatprep.subr.bf16.mxu0 %v539_v2 }
  0x92   :  { %464 = vmatpush3.bf16.msra.mxu0 %v499_v28 }
  0x93   :  { %465 = vmatprep.subr.bf16.mxu0 %v539_v2 }
  0x96   :  { %466 = vmatpush3.bf16.msra.mxu0 %v500_v29 }
  0x97   :  { %467 = vmatprep.subr.bf16.mxu0 %v539_v2 }
  0x9a   :  { %468 = vmatpush3.bf16.msra.mxu0 %v501_v30 }
  0x9b   :  { %469 = vmatprep.subr.bf16.mxu0 %v539_v2 }
  0x9e   :  { %470 = vmatpush3.bf16.msra.mxu0 %v502_v31 }
  0x9f   :  { %471 = vmatprep.subr.bf16.mxu0 %v539_v2 }
  0xa2   :  { %472 = vmatpush3.bf16.msra.mxu0 %v503_v32 }
  0xa3   :  { %473 = vmatprep.subr.bf16.mxu0 %v539_v2 }
  0xa6   :  { %474 = vmatpush3.bf16.msra.mxu0 %v504_v43 }
  0xa7   :  { %475 = vmatprep.subr.bf16.mxu0 %v539_v2 }
  0xaa   :  { %476 = vmatpush3.bf16.msra.mxu0 %v505_v44 }
 0x160   :  { %v117_v34 = vpop.f32.mrb[0].mxu0 }
 0x161   :  { %v118_v35 = vadd.f32 %v388_v33, %v117_v34  ;;  %v439_v36 = vpop.f32.mrb[1].mxu0 }
 0x162   :  { %v120_v37 = vpop.f32.mrb[2].mxu0 }
 0x163   :  { %v121_v38 = vadd.f32 %v388_v33, %v120_v37  ;;  %v440_v39 = vpop.f32.mrb[3].mxu0  ;;  %v124_v40 = vmax.f32 %v118_v35, 0.0 }
 0x165   :  { %v125_v41 = vmax.f32 %v121_v38, 0.0 }
 0x167   :  { %v126_v42 = vpack.c.bf16 %v125_v41, %v124_v40 }
 0x169   :  { %458 = vmatmul.mubr.bf16.vlgmr.msra.gmra.mrb[0].mxu1 %v126_v42 }
 0x23c   :  { %v232_v46 = vpop.f32.mrb[0].mxu1 }
 0x23d   :  { %v233_v47 = vadd.f32 %v392_v45, %v232_v46  ;;  %v459_v48 = vpop.f32.mrb[1].mxu1 }
 0x23e   :  { %v235_v49 = vpop.f32.mrb[2].mxu1 }
 0x23f   :  { %v236_v50 = vadd.f32 %v392_v45, %v235_v49  ;;  %v460_v51 = vpop.f32.mrb[3].mxu1  ;;  %v239_v52 = vmax.f32 %v233_v47, 0.0 }
 0x241   :  { %v240_v53 = vmax.f32 %v236_v50, 0.0 }
 0x243   :  { %v241_v54 = vpack.c.bf16 %v240_v53, %v239_v52 }
 0x245   :  { %478 = vmatmul.mubr.bf16.vlgmr.msra.gmra.mrb[4].mxu0 %v241_v54 }
 0x318   :  { %v347_v56 = vpop.f32.mrb[4].mxu0 }
 0x319   :  { %v348_v57 = vadd.f32 %v401_v55, %v347_v56  ;;  %v479_v58 = vpop.f32.mrb[5].mxu0 }
 0x31a   :  { %v350_v59 = vpop.f32.mrb[6].mxu0 }
 0x31b   :  { %v410_v60 = vmul.f32 -1.442695, %v348_v57  ;;  %v351_v61 = vadd.f32 %v401_v55, %v350_v59  ;;  %v480_v62 = vpop.f32.mrb[7].mxu0 }
 0x31d   :  { %506 = vpow2.f32 %v410_v60  ;;  %v411_v63 = vmul.f32 -1.442695, %v351_v61 }
 0x31f   :  { %508 = vpow2.f32 %v411_v63 }
 0x327   :  { %v507_v0 = vpop.eup %506 }
 0x328   :  { %v360_v1 = vadd.f32 1.0, %v507_v0 }
 0x329   :  { %v509_v2 = vpop.eup %508 }
 0x32a   :  { %510 = vrcp.f32 %v360_v1  ;;  %v361_v3 = vadd.f32 1.0, %v509_v2 }
 0x32c   :  { %512 = vrcp.f32 %v361_v3 }
 0x334   :  { %v511_v4 = vpop.eup %510 }
 0x335   :  { %367 = vst.msk [vmem:[#allocation2] sm:$0xff] %vm366_vm8, %v511_v4 }
 0x336   :  { %v513_v5 = vpop.eup %512 }
 0x337   :  { %368 = vst.msk [vmem:[#allocation2 + $0x8] sm:$0xff] %vm366_vm8, %v513_v5 }
 0x338   :  { %525 = shalt.err (!%p522_p4)
}
 0x339   :  { %s526_s28 = scalar_lea.hbm %s710_s8, 256 }
 0x33a   :  { %p527_p5 = scmp.ne.s32.totalorder %s710_s8, %s526_s28  ;;  %p530_p6 = scmp.lt.u32.totalorder %s526_s28, %s710_s8 }
 0x33c   :  { %p532_p7 = pnand %p530_p6, %p527_p5 }
 0x33e   :  { %535 = shalt.err (!%p532_p7)
}
 0x33f   :  { %s542_s10 = smov 128   ;;  %s543_s11 = smov 8  }
 0x340   :  { %380 = dma.vmem_to_hbm [thread:$0]  %s375_s6, 256, %s710_s8, [#allocation3], %s542_s10, %s542_s10, %s543_s11  }
 0x341   :  { %536 = dma.done.wait [#allocation3], 256  }
 0x342   :  { %537 = vsyncadd [#allocation3], 4294967040 }
 0x343   :  { %384 = vsyncpa [#allocation3], 1 }

</bundles_post_ra>
